<compile_context>
chip_gen: v7x
topology: tpu7x:2x2x1
jax: 0.10.0
libtpu: 0.0.40
codegen_flags: <defaults>
</compile_context>

<pallas_src>
import math

import jax
import jax.numpy as jnp
import numpy as np
from jax.experimental import pallas as pl
from jax.experimental.pallas import tpu as pltpu

_LANE = 128
_SUBLANE = 8


def _round_up(n, m):
    return ((n + m - 1) // m) * m


def _gelu_tanh(x):
    # GELU(approximate='tanh'), identical to PyTorch's tanh approximation (kept in f32).
    c = math.sqrt(2.0 / math.pi)
    return 0.5 * x * (1.0 + jnp.tanh(c * (x + 0.044715 * x * x * x)))


def _make_mlp_kernel(num_layers, use_residual, residual_has_proj):
    """Fused MLP kernel body. bf16 MXU operands, f32 accumulation / elementwise.

    Ref order: x, (W_0, b_0), ..., (W_{L-1}, b_{L-1}), [Wr], out
    If the residual path has a projection, its bias is already folded into b_{L-1}
    host-side and its matmul is a second accumulating dot on the final f32 acc.
    """

    def kernel(*refs):
        x_ref = refs[0]
        o_ref = refs[-1]
        idx = 1

        x_bf16 = x_ref[...].astype(jnp.bfloat16)
        h = x_bf16
        acc = None
        for layer in range(num_layers):
            is_last = layer == num_layers - 1
            w = refs[idx][...]        # bf16 (K_p, N_p)
            b = refs[idx + 1][...]    # f32  (1,  N_p)
            idx += 2

            acc = jnp.dot(h, w, preferred_element_type=jnp.float32) + b
            if not is_last:
                h = _gelu_tanh(acc).astype(jnp.bfloat16)   # GELU in f32, bf16 into next MXU pass

        if use_residual:
            if residual_has_proj:
                wr = refs[idx][...]   # bf16 (in_p, out_p); bias already folded into b_{L-1}
                acc = acc + jnp.dot(x_bf16, wr, preferred_element_type=jnp.float32)
            else:
                # Identity residual (in_features == out_features, identical padding).
                acc = acc + x_ref[...].astype(jnp.float32)

        o_ref[...] = acc.astype(o_ref.dtype)

    return kernel


def mlp_forward(x, layer_params, residual_params=None, add_residual_connection=False,
                block_m=512):
    """Runs the fused MLP Pallas kernel.

    x:               (M, in_features) float32
    layer_params:    list of (W, b) with W: (fan_in, fan_out), b: (1, fan_out)
    residual_params: (Wr, br) projection for the residual path, or None (identity)
    """
    M, in_features = x.shape
    out_features = layer_params[-1][0].shape[1]
    num_layers = len(layer_params)
    residual_has_proj = add_residual_connection and (residual_params is not None)

    if add_residual_connection and residual_params is None:
        assert in_features == out_features, "identity residual requires in_features == out_features"

    in_p = _round_up(in_features, _LANE)
    out_p = _round_up(out_features, _LANE)

    # Batch tiling: TM rows per grid step (clamped for tiny batches); pad M so the grid is exact.
    TM = min(block_m, _round_up(M, _SUBLANE))
    M_pad = _round_up(M, TM)

    x_pad = jnp.pad(x, ((0, M_pad - M), (0, in_p - in_features)))

    # Zero-pad weights / biases once on the host so every contraction & lane dim is a multiple
    # of 128; weights go to bf16 (MXU native), biases stay f32. The residual-projection bias is
    # folded into the last layer's bias so the kernel does one fewer vector add per tile.
    weights = []
    biases = []
    for li, (w, b) in enumerate(layer_params):
        k, n = w.shape
        k_p, n_p = _round_up(k, _LANE), _round_up(n, _LANE)
        w_p = jnp.pad(w, ((0, k_p - k), (0, n_p - n))).astype(jnp.bfloat16)
        b_p = jnp.pad(b.reshape(1, -1), ((0, 0), (0, n_p - n))).astype(jnp.float32)
        if li == num_layers - 1 and residual_has_proj:
            br = residual_params[1].reshape(1, -1)
            b_p = b_p + jnp.pad(br, ((0, 0), (0, out_p - br.shape[1]))).astype(jnp.float32)
        weights.append(w_p)
        biases.append(b_p)

    residual_w = None
    if residual_has_proj:
        wr = residual_params[0]
        residual_w = jnp.pad(
            wr, ((0, in_p - wr.shape[0]), (0, out_p - wr.shape[1]))).astype(jnp.bfloat16)

    operands = [x_pad]
    for w_p, b_p in zip(weights, biases):
        operands += [w_p, b_p]
    if residual_w is not None:
        operands.append(residual_w)

    grid = (M_pad // TM,)

    in_specs = [pl.BlockSpec((TM, in_p), lambda i: (i, 0))]
    for op in operands[1:]:
        # Weights / biases: one block covering the full padded array; the block index is
        # constant across grid steps so they stay VMEM-resident (fetched once).
        in_specs.append(pl.BlockSpec(op.shape, lambda i: (0, 0)))
    out_spec = pl.BlockSpec((TM, out_p), lambda i: (i, 0))

    # Advisory cost estimate so XLA schedules/overlaps surrounding ops sensibly.
    all_weights = weights + ([residual_w] if residual_w is not None else [])
    flops = 2 * M_pad * sum(int(w.shape[0]) * int(w.shape[1]) for w in all_weights)
    transcendentals = M_pad * sum(int(w.shape[1]) for w in weights[:-1])
    bytes_accessed = int(
        x_pad.size * 4
        + sum(int(w.size) * 2 for w in all_weights)
        + sum(int(b.size) * 4 for b in biases)
        + M_pad * out_p * 4
    )

    # Explicit VMEM budget: resident weights + double-buffered activation tiles + headroom for
    # f32 intermediates. Clamped to stay well inside v7x's 64 MiB physical VMEM.
    widths = [in_p] + [int(w.shape[1]) for w in weights]
    weight_bytes = (sum(int(w.size) * 2 for w in all_weights)
                    + sum(int(b.size) * 4 for b in biases))
    act_bytes = 2 * TM * (in_p + out_p) * 4 + 4 * TM * max(widths) * 4
    vmem_limit = int(min(max(2 * (weight_bytes + act_bytes), 16 << 20), 48 << 20))

    kernel = _make_mlp_kernel(num_layers, add_residual_connection, residual_has_proj)

    out_pad = pl.pallas_call(
        kernel,
        out_shape=jax.ShapeDtypeStruct((M_pad, out_p), x.dtype),
        grid_spec=pltpu.PrefetchScalarGridSpec(
            num_scalar_prefetch=0,
            grid=grid,
            in_specs=in_specs,
            out_specs=out_spec,
        ),
        compiler_params=pltpu.CompilerParams(
            dimension_semantics=("parallel",),  # M-tiles shard across TCs on v7x when grid > 1
            vmem_limit_bytes=vmem_limit,
        ),
        cost_estimate=pl.CostEstimate(
            flops=flops, transcendentals=transcendentals, bytes_accessed=bytes_accessed),
    )(*operands)

    # Strip batch / lane padding.
    return out_pad[:M, :out_features]


def _init_linear(key, fan_in, fan_out, dtype=jnp.float32):
    """Deterministic init mimicking PyTorch nn.Linear default (uniform +/- 1/sqrt(fan_in))."""
    kw, kb = jax.random.split(key)
    bound = 1.0 / math.sqrt(fan_in)
    w = jax.random.uniform(kw, (fan_in, fan_out), dtype, minval=-bound, maxval=bound)
    b = jax.random.uniform(kb, (1, fan_out), dtype, minval=-bound, maxval=bound)
    return w, b


def _reference_mlp(x, layer_params, residual_params, add_residual_connection):
    """Pure-JAX reference mirroring the kernel's bf16-in / f32-accumulate convention."""

    def bf16_dot(a, w):
        return jnp.dot(a.astype(jnp.bfloat16).astype(jnp.float32),
                       w.astype(jnp.bfloat16).astype(jnp.float32))

    n = len(layer_params)
    h = x
    for i, (w, b) in enumerate(layer_params):
        h = bf16_dot(h, w) + b
        if i < n - 1:
            h = _gelu_tanh(h)
    if add_residual_connection:
        if residual_params is not None:
            wr, br = residual_params
            h = h + bf16_dot(x, wr) + br
        else:
            h = h + x
    return h


if __name__ == "__main__":
    # Module config: MLP(in_features=32, out_features=16, gate_sizes=(64, 48),
    #                    bias=True, add_residual_connection=True)
    in_features = 32
    out_features = 16
    gate_sizes = (64, 48)
    add_residual_connection = True
    batch = 8

    key = jax.random.PRNGKey(0)
    keys = jax.random.split(key, 8)

    x = jax.random.normal(keys[0], (batch, in_features), jnp.float32)

    # Hidden linear layers + final projection.
    layer_params = []
    prev = in_features
    kidx = 1
    for hdim in gate_sizes:
        layer_params.append(_init_linear(keys[kidx], prev, hdim))
        prev = hdim
        kidx += 1
    layer_params.append(_init_linear(keys[kidx], prev, out_features))
    kidx += 1

    # Residual connector: Linear(in, out) since in_features != out_features.
    residual_params = (
        _init_linear(keys[kidx], in_features, out_features)
        if (add_residual_connection and in_features != out_features)
        else None
    )

    out = mlp_forward(
        x, layer_params, residual_params, add_residual_connection=add_residual_connection
    )
    out = jax.block_until_ready(out)

    ref = _reference_mlp(x, layer_params, residual_params, add_residual_connection)
    np.testing.assert_allclose(np.asarray(out), np.asarray(ref), rtol=1e-2, atol=1e-2)

    print("KERNEL_OK")
</pallas_src>

<mosaic_0001>
module attributes {stable_mosaic.version = 11 : i64} {
  func.func @kernel(%arg0: i32, %arg1: memref<8x128xf32, #tpu.memory_space<vmem>>, %arg2: memref<128x128xbf16, #tpu.memory_space<vmem>>, %arg3: memref<1x128xf32, #tpu.memory_space<vmem>>, %arg4: memref<128x128xbf16, #tpu.memory_space<vmem>>, %arg5: memref<1x128xf32, #tpu.memory_space<vmem>>, %arg6: memref<128x128xbf16, #tpu.memory_space<vmem>>, %arg7: memref<1x128xf32, #tpu.memory_space<vmem>>, %arg8: memref<128x128xbf16, #tpu.memory_space<vmem>>, %arg9: memref<8x128xf32, #tpu.memory_space<vmem>>) attributes {dimension_semantics = [#tpu.dimension_semantics<parallel>], iteration_bounds = array<i64: 1>, scalar_prefetch = 0 : i64, scratch_operands = 0 : i64, tpu.core_type = #tpu.core_type<tc>, window_params = [{transform_indices = @transform_0, window_bounds = array<i64: 8, 128>}, {pipeline_mode = #tpu.pipeline_mode<synchronous>, transform_indices = @transform_1, window_bounds = array<i64: 128, 128>}, {pipeline_mode = #tpu.pipeline_mode<synchronous>, transform_indices = @transform_2, window_bounds = array<i64: 1, 128>}, {pipeline_mode = #tpu.pipeline_mode<synchronous>, transform_indices = @transform_3, window_bounds = array<i64: 128, 128>}, {pipeline_mode = #tpu.pipeline_mode<synchronous>, transform_indices = @transform_4, window_bounds = array<i64: 1, 128>}, {pipeline_mode = #tpu.pipeline_mode<synchronous>, transform_indices = @transform_5, window_bounds = array<i64: 128, 128>}, {pipeline_mode = #tpu.pipeline_mode<synchronous>, transform_indices = @transform_6, window_bounds = array<i64: 1, 128>}, {pipeline_mode = #tpu.pipeline_mode<synchronous>, transform_indices = @transform_7, window_bounds = array<i64: 128, 128>}, {transform_indices = @transform_8, window_bounds = array<i64: 8, 128>}]} {
    %c0 = arith.constant 0 : index
    %c0_0 = arith.constant 0 : index
    %0 = vector.load %arg1[%c0, %c0_0] : memref<8x128xf32, #tpu.memory_space<vmem>>, vector<8x128xf32>
    %1 = arith.truncf %0 : vector<8x128xf32> to vector<8x128xbf16>
    %c0_1 = arith.constant 0 : index
    %c0_2 = arith.constant 0 : index
    %2 = vector.load %arg2[%c0_1, %c0_2] : memref<128x128xbf16, #tpu.memory_space<vmem>>, vector<128x128xbf16>
    %c0_3 = arith.constant 0 : index
    %c0_4 = arith.constant 0 : index
    %3 = vector.load %arg3[%c0_3, %c0_4] : memref<1x128xf32, #tpu.memory_space<vmem>>, vector<1x128xf32>
    %cst = arith.constant dense<0.000000e+00> : vector<8x128xf32>
    %4 = tpu.matmul %1, %2, %cst {dimension_numbers = #tpu.dot_dimension_numbers<[1], [0], [0], [1], [0, 0, 1, 1], [], []>} : vector<8x128xbf16>, vector<128x128xbf16>, vector<8x128xf32> -> vector<8x128xf32>
    %5 = vector.broadcast %3 : vector<1x128xf32> to vector<8x128xf32>
    %6 = arith.addf %4, %5 : vector<8x128xf32>
    %cst_5 = arith.constant 5.000000e-01 : f32
    %7 = vector.broadcast %cst_5 : f32 to vector<8x128xf32>
    %8 = arith.mulf %7, %6 : vector<8x128xf32>
    %cst_6 = arith.constant 4.471500e-02 : f32
    %9 = vector.broadcast %cst_6 : f32 to vector<8x128xf32>
    %10 = arith.mulf %9, %6 : vector<8x128xf32>
    %11 = arith.mulf %10, %6 : vector<8x128xf32>
    %12 = arith.mulf %11, %6 : vector<8x128xf32>
    %13 = arith.addf %6, %12 : vector<8x128xf32>
    %cst_7 = arith.constant 0.797884583 : f32
    %14 = vector.broadcast %cst_7 : f32 to vector<8x128xf32>
    %15 = arith.mulf %14, %13 : vector<8x128xf32>
    %16 = math.tanh %15 : vector<8x128xf32>
    %cst_8 = arith.constant 1.000000e+00 : f32
    %17 = vector.broadcast %cst_8 : f32 to vector<8x128xf32>
    %18 = arith.addf %17, %16 : vector<8x128xf32>
    %19 = arith.mulf %8, %18 : vector<8x128xf32>
    %20 = arith.truncf %19 : vector<8x128xf32> to vector<8x128xbf16>
    %c0_9 = arith.constant 0 : index
    %c0_10 = arith.constant 0 : index
    %21 = vector.load %arg4[%c0_9, %c0_10] : memref<128x128xbf16, #tpu.memory_space<vmem>>, vector<128x128xbf16>
    %c0_11 = arith.constant 0 : index
    %c0_12 = arith.constant 0 : index
    %22 = vector.load %arg5[%c0_11, %c0_12] : memref<1x128xf32, #tpu.memory_space<vmem>>, vector<1x128xf32>
    %cst_13 = arith.constant dense<0.000000e+00> : vector<8x128xf32>
    %23 = tpu.matmul %20, %21, %cst_13 {dimension_numbers = #tpu.dot_dimension_numbers<[1], [0], [0], [1], [0, 0, 1, 1], [], []>} : vector<8x128xbf16>, vector<128x128xbf16>, vector<8x128xf32> -> vector<8x128xf32>
    %24 = vector.broadcast %22 : vector<1x128xf32> to vector<8x128xf32>
    %25 = arith.addf %23, %24 : vector<8x128xf32>
    %cst_14 = arith.constant 5.000000e-01 : f32
    %26 = vector.broadcast %cst_14 : f32 to vector<8x128xf32>
    %27 = arith.mulf %26, %25 : vector<8x128xf32>
    %cst_15 = arith.constant 4.471500e-02 : f32
    %28 = vector.broadcast %cst_15 : f32 to vector<8x128xf32>
    %29 = arith.mulf %28, %25 : vector<8x128xf32>
    %30 = arith.mulf %29, %25 : vector<8x128xf32>
    %31 = arith.mulf %30, %25 : vector<8x128xf32>
    %32 = arith.addf %25, %31 : vector<8x128xf32>
    %cst_16 = arith.constant 0.797884583 : f32
    %33 = vector.broadcast %cst_16 : f32 to vector<8x128xf32>
    %34 = arith.mulf %33, %32 : vector<8x128xf32>
    %35 = math.tanh %34 : vector<8x128xf32>
    %cst_17 = arith.constant 1.000000e+00 : f32
    %36 = vector.broadcast %cst_17 : f32 to vector<8x128xf32>
    %37 = arith.addf %36, %35 : vector<8x128xf32>
    %38 = arith.mulf %27, %37 : vector<8x128xf32>
    %39 = arith.truncf %38 : vector<8x128xf32> to vector<8x128xbf16>
    %c0_18 = arith.constant 0 : index
    %c0_19 = arith.constant 0 : index
    %40 = vector.load %arg6[%c0_18, %c0_19] : memref<128x128xbf16, #tpu.memory_space<vmem>>, vector<128x128xbf16>
    %c0_20 = arith.constant 0 : index
    %c0_21 = arith.constant 0 : index
    %41 = vector.load %arg7[%c0_20, %c0_21] : memref<1x128xf32, #tpu.memory_space<vmem>>, vector<1x128xf32>
    %cst_22 = arith.constant dense<0.000000e+00> : vector<8x128xf32>
    %42 = tpu.matmul %39, %40, %cst_22 {dimension_numbers = #tpu.dot_dimension_numbers<[1], [0], [0], [1], [0, 0, 1, 1], [], []>} : vector<8x128xbf16>, vector<128x128xbf16>, vector<8x128xf32> -> vector<8x128xf32>
    %43 = vector.broadcast %41 : vector<1x128xf32> to vector<8x128xf32>
    %44 = arith.addf %42, %43 : vector<8x128xf32>
    %c0_23 = arith.constant 0 : index
    %c0_24 = arith.constant 0 : index
    %45 = vector.load %arg8[%c0_23, %c0_24] : memref<128x128xbf16, #tpu.memory_space<vmem>>, vector<128x128xbf16>
    %cst_25 = arith.constant dense<0.000000e+00> : vector<8x128xf32>
    %46 = tpu.matmul %1, %45, %cst_25 {dimension_numbers = #tpu.dot_dimension_numbers<[1], [0], [0], [1], [0, 0, 1, 1], [], []>} : vector<8x128xbf16>, vector<128x128xbf16>, vector<8x128xf32> -> vector<8x128xf32>
    %47 = arith.addf %44, %46 : vector<8x128xf32>
    %c0_26 = arith.constant 0 : index
    %c0_27 = arith.constant 0 : index
    %48 = vector.load %arg9[%c0_26, %c0_27] : memref<8x128xf32, #tpu.memory_space<vmem>>, vector<8x128xf32>
    tpu.vector_store %arg9[%c0_26, %c0_27], %47 {strides = array<i32>} : memref<8x128xf32, #tpu.memory_space<vmem>>, vector<8x128xf32>,
    return
  }
  func.func @transform_0(%arg0: i32) -> (i32, i32) {
    %c0_i32 = arith.constant 0 : i32
    %c0_i32_0 = arith.constant 0 : i32
    return %arg0, %c0_i32 : i32, i32
  }
  func.func @transform_1(%arg0: i32) -> (i32, i32) {
    %c0_i32 = arith.constant 0 : i32
    %c0_i32_0 = arith.constant 0 : i32
    %c0_i32_1 = arith.constant 0 : i32
    return %c0_i32, %c0_i32_0 : i32, i32
  }
  func.func @transform_2(%arg0: i32) -> (i32, i32) {
    %c0_i32 = arith.constant 0 : i32
    %c0_i32_0 = arith.constant 0 : i32
    %c0_i32_1 = arith.constant 0 : i32
    return %c0_i32, %c0_i32_0 : i32, i32
  }
  func.func @transform_3(%arg0: i32) -> (i32, i32) {
    %c0_i32 = arith.constant 0 : i32
    %c0_i32_0 = arith.constant 0 : i32
    %c0_i32_1 = arith.constant 0 : i32
    return %c0_i32, %c0_i32_0 : i32, i32
  }
  func.func @transform_4(%arg0: i32) -> (i32, i32) {
    %c0_i32 = arith.constant 0 : i32
    %c0_i32_0 = arith.constant 0 : i32
    %c0_i32_1 = arith.constant 0 : i32
    return %c0_i32, %c0_i32_0 : i32, i32
  }
  func.func @transform_5(%arg0: i32) -> (i32, i32) {
    %c0_i32 = arith.constant 0 : i32
    %c0_i32_0 = arith.constant 0 : i32
    %c0_i32_1 = arith.constant 0 : i32
    return %c0_i32, %c0_i32_0 : i32, i32
  }
  func.func @transform_6(%arg0: i32) -> (i32, i32) {
    %c0_i32 = arith.constant 0 : i32
    %c0_i32_0 = arith.constant 0 : i32
    %c0_i32_1 = arith.constant 0 : i32
    return %c0_i32, %c0_i32_0 : i32, i32
  }
  func.func @transform_7(%arg0: i32) -> (i32, i32) {
    %c0_i32 = arith.constant 0 : i32
    %c0_i32_0 = arith.constant 0 : i32
    %c0_i32_1 = arith.constant 0 : i32
    return %c0_i32, %c0_i32_0 : i32, i32
  }
  func.func @transform_8(%arg0: i32) -> (i32, i32) {
    %c0_i32 = arith.constant 0 : i32
    %c0_i32_0 = arith.constant 0 : i32
    return %arg0, %c0_i32 : i32, i32
  }
}

</mosaic_0001>

<bundles_post_ra>
// kernel: tpu_custom_call.1
= control target key start
LH: loop header
LB: loop body
LE: loop exit
PB: predicated region body
PF: predicated region fallthrough
CT: control target
= control target key end

     0   :  { %13 = vsyncpa [#allocation3], 0  ;;  %s1109_s0 = inlined_call_operand.hbm [shape: f32[8,128], index: 0, kind: input, shape index: {}]   ;;  %s1110_s1 = inlined_call_operand.hbm [shape: bf16[128,128], index: 1, kind: input, shape index: {}]   ;;  %s1111_s2 = inlined_call_operand.vmem [shape: f32[1,128], index: 2, kind: input, shape index: {}]   ;;  %s1112_s3 = inlined_call_operand.hbm [shape: bf16[128,128], index: 3, kind: input, shape index: {}]   ;;  %s1113_s4 = inlined_call_operand.vmem [shape: f32[1,128], index: 4, kind: input, shape index: {}]   ;;  %s1114_s5 = inlined_call_operand.hbm [shape: bf16[128,128], index: 5, kind: input, shape index: {}]   ;;  %s1115_s6 = inlined_call_operand.vmem [shape: f32[1,128], index: 6, kind: input, shape index: {}]   ;;  %s1116_s7 = inlined_call_operand.hbm [shape: bf16[128,128], index: 7, kind: input, shape index: {}]   ;;  %s1117_s8 = inlined_call_operand.hbm [shape: f32[8,128], index: 8, kind: output, shape index: {}]  }
   0x1   :  { %14 = vsyncpa [#allocation6], 0 }
   0x2   :  { %15 = vsyncpa [#allocation9], 0 }
   0x3   :  { %16 = vsyncpa [#allocation4], 0  ;;  %s917_s27 = smov [#allocation5]   ;;  %s777_s9 = scalar_lea.hbm %s1110_s1, 1024 }
   0x4   :  { %s32_s28 = sshll.u32 %s917_s27, 4  ;;  %p778_p0 = scmp.ne.s32.totalorder %s1110_s1, %s777_s9  ;;  %s33_s28 = int_to_ptr.vmem [resolvable:$true] %s32_s28 }
   0x5   :  { %p781_p1 = scmp.lt.u32.totalorder %s777_s9, %s1110_s1 }
   0x7   :  { %p783_p2 = pnand %p781_p1, %p778_p0 }
   0x9   :  { %786 = shalt.err (!%p783_p2)
}
   0xa   :  { %s787_s14 = scalar_lea.vmem %s33_s28, 1024  ;;  %p792_p4 = scmp.lt.s32.totalorder %s33_s28, %s33_s28 }
   0xb   :  { %p788_p3 = scmp.ne.s32.totalorder %s33_s28, %s787_s14  ;;  %p793_p5 = scmp.lt.s32.totalorder %s787_s14, %s787_s14 }
   0xd   :  { %p794_p6 = por %p793_p5, %p792_p4 }
   0xf   :  { %p795_p7 = pnand %p794_p6, %p788_p3 }
  0x11   :  { %798 = shalt.err (!%p795_p7)
}
  0x12   :  { %s918_s15 = smov 64   ;;  %s919_s16 = smov 4  }
  0x13   :  { %38 = dma.hbm_to_vmem [thread:$0]  %s1110_s1, 1024, %s33_s28, [#allocation6], %s918_s15, %s918_s15, %s919_s16  }
  0x14   :  { %s920_s19 = smov [#allocation8]   ;;  %s921_s21 = smov [#allocation2]  }
  0x15   :  { %s60_s20 = sshll.u32 %s920_s19, 4  ;;  %s23_s22 = sshll.u32 %s921_s21, 4  ;;  %s61_s20 = int_to_ptr.vmem [resolvable:$true] %s60_s20  ;;  %s24_s22 = int_to_ptr.vmem [resolvable:$true] %s23_s22 }
  0x16   :  { %s799_s25 = scalar_lea.hbm %s1114_s5, 1024 }
  0x17   :  { %p800_p8 = scmp.ne.s32.totalorder %s1114_s5, %s799_s25  ;;  %p803_p9 = scmp.lt.u32.totalorder %s799_s25, %s1114_s5 }
  0x19   :  { %p805_p10 = pnand %p803_p9, %p800_p8 }
  0x1b   :  { %808 = shalt.err (!%p805_p10)
}
  0x1c   :  { %s809_s1 = scalar_lea.vmem %s61_s20, 1024  ;;  %p814_p12 = scmp.lt.s32.totalorder %s61_s20, %s61_s20 }
  0x1d   :  { %p810_p11 = scmp.ne.s32.totalorder %s61_s20, %s809_s1  ;;  %p815_p13 = scmp.lt.s32.totalorder %s809_s1, %s809_s1 }
  0x1f   :  { %p816_p0 = por %p815_p13, %p814_p12 }
  0x21   :  { %p817_p1 = pnand %p816_p0, %p810_p11 }
  0x23   :  { %820 = shalt.err (!%p817_p1)
}
  0x24   :  { %66 = dma.hbm_to_vmem [thread:$0]  %s1114_s5, 1024, %s61_s20, [#allocation9], %s918_s15, %s918_s15, %s919_s16  }
  0x25   :  { %s821_s12 = scalar_lea.hbm %s1109_s0, 128 }
  0x26   :  { %p822_p2 = scmp.ne.s32.totalorder %s1109_s0, %s821_s12  ;;  %p825_p3 = scmp.lt.u32.totalorder %s821_s12, %s1109_s0 }
  0x28   :  { %p827_p4 = pnand %p825_p3, %p822_p2 }
  0x2a   :  { %830 = shalt.err (!%p827_p4)
}
  0x2b   :  { %s831_s19 = scalar_lea.vmem %s24_s22, 128  ;;  %p836_p6 = scmp.lt.s32.totalorder %s24_s22, %s24_s22 }
  0x2c   :  { %p832_p5 = scmp.ne.s32.totalorder %s24_s22, %s831_s19  ;;  %p837_p7 = scmp.lt.s32.totalorder %s831_s19, %s831_s19 }
  0x2e   :  { %p838_p8 = por %p837_p7, %p836_p6 }
  0x30   :  { %p839_p9 = pnand %p838_p8, %p832_p5 }
  0x32   :  { %842 = shalt.err (!%p839_p9)
}
  0x33   :  { %26 = dma.hbm_to_vmem [thread:$0]  %s1109_s0, 128, %s24_s22, [#allocation3]  }
  0x34   :  { %s922_s21 = smov [#allocation7]   ;;  %s923_s24 = smov [#allocation10]  }
  0x35   :  { %s46_s23 = sshll.u32 %s922_s21, 4  ;;  %s74_s25 = sshll.u32 %s923_s24, 4  ;;  %s47_s23 = int_to_ptr.vmem [resolvable:$true] %s46_s23  ;;  %s75_s25 = int_to_ptr.vmem [resolvable:$true] %s74_s25 }
  0x36   :  { %s843_s29 = scalar_lea.hbm %s1112_s3, 1024 }
  0x37   :  { %p844_p10 = scmp.ne.s32.totalorder %s1112_s3, %s843_s29  ;;  %p847_p11 = scmp.lt.u32.totalorder %s843_s29, %s1112_s3 }
  0x39   :  { %p849_p12 = pnand %p847_p11, %p844_p10 }
  0x3b   :  { %852 = shalt.err (!%p849_p12)
}
  0x3c   :  { %s853_s0 = scalar_lea.vmem %s47_s23, 1024  ;;  %p858_p0 = scmp.lt.s32.totalorder %s47_s23, %s47_s23 }
  0x3d   :  { %p854_p13 = scmp.ne.s32.totalorder %s47_s23, %s853_s0  ;;  %p859_p1 = scmp.lt.s32.totalorder %s853_s0, %s853_s0 }
  0x3f   :  { %p860_p2 = por %p859_p1, %p858_p0 }
  0x41   :  { %p861_p3 = pnand %p860_p2, %p854_p13 }
  0x43   :  { %864 = shalt.err (!%p861_p3)
}
  0x44   :  { %52 = dma.hbm_to_vmem [thread:$0]  %s1112_s3, 1024, %s47_s23, [#allocation6], %s918_s15, %s918_s15, %s919_s16  }
  0x45   :  { %s865_s13 = scalar_lea.hbm %s1116_s7, 1024 }
  0x46   :  { %p866_p4 = scmp.ne.s32.totalorder %s1116_s7, %s865_s13  ;;  %p869_p5 = scmp.lt.u32.totalorder %s865_s13, %s1116_s7 }
  0x48   :  { %p871_p6 = pnand %p869_p5, %p866_p4 }
  0x4a   :  { %874 = shalt.err (!%p871_p6)
}
  0x4b   :  { %s875_s5 = scalar_lea.vmem %s75_s25, 1024  ;;  %p880_p8 = scmp.lt.s32.totalorder %s75_s25, %s75_s25 }
  0x4c   :  { %p876_p7 = scmp.ne.s32.totalorder %s75_s25, %s875_s5  ;;  %p881_p9 = scmp.lt.s32.totalorder %s875_s5, %s875_s5 }
  0x4e   :  { %p882_p10 = por %p881_p9, %p880_p8 }
  0x50   :  { %p883_p11 = pnand %p882_p10, %p876_p7 }
  0x52   :  { %886 = shalt.err (!%p883_p11)
}
  0x53   :  { %80 = dma.hbm_to_vmem [thread:$0]  %s1116_s7, 1024, %s75_s25, [#allocation9], %s918_s15, %s918_s15, %s919_s16  }
  0x54   :  { %909 = dma.done.wait [#allocation3], 128  }
  0x55   :  { %910 = vsyncadd [#allocation3], 4294967168 }
  0x56   :  { %911 = dma.done.wait [#allocation6], 2048  }
  0x57   :  { %912 = vsyncadd [#allocation6], 4294965248 }
  0x58   :  { %913 = dma.done.wait [#allocation9], 2048  }
  0x59   :  { %914 = vsyncadd [#allocation9], 4294965248  ;;  %v924_v0 = vmov 0.0   ;;  %vm925_vm0 = vmmov 0   ;;  %v741_v1 = vld [vmem:[#allocation5] sm:$0xff]   ;;  %v742_v2 = vld [vmem:[#allocation5 + $0x8] sm:$0xff]  }
  0x5a   :  { %646 = vmatprep.subr.bf16.mxu1 %v924_v0  ;;  %662 = vmatprep.mubr.msk.bf16.mxu1 %vm925_vm0, %v924_v0  ;;  %v743_v3 = vld [vmem:[#allocation5 + $0x10] sm:$0xff]   ;;  %v744_v4 = vld [vmem:[#allocation5 + $0x18] sm:$0xff]   ;;  %v745_v5 = vld [vmem:[#allocation5 + $0x20] sm:$0xff]   ;;  %s926_s23 = smov [#allocation11]  }
  0x5b   :  { %686 = vmatprep.subr.bf16.mxu0 %v924_v0  ;;  %702 = vmatprep.mubr.msk.bf16.mxu0 %vm925_vm0, %v924_v0  ;;  %v746_v6 = vld [vmem:[#allocation5 + $0x28] sm:$0xff]   ;;  %v747_v7 = vld [vmem:[#allocation5 + $0x30] sm:$0xff]   ;;  %v748_v8 = vld [vmem:[#allocation5 + $0x38] sm:$0xff]   ;;  %s564_s24 = sshll.u32 %s926_s23, 4  ;;  %s565_s24 = int_to_ptr.vmem [resolvable:$true] %s564_s24 }
  0x5c   :  { %647 = vmatpush3.bf16.msra.mxu1 %v741_v1  ;;  %v97_v9 = vld [vmem:[#allocation2] sm:$0xff]  ;;  %v749_v11 = vld [vmem:[#allocation7] sm:$0xff]   ;;  %v750_v12 = vld [vmem:[#allocation7 + $0x8] sm:$0xff]   ;;  %s887_s25 = scalar_lea.vmem %s565_s24, 128  ;;  %p892_p13 = scmp.lt.s32.totalorder %s565_s24, %s565_s24 }
  0x5d   :  { %648 = vmatprep.subr.bf16.mxu1 %v924_v0  ;;  %v1057_v10 = vpack.c.bf16 %v97_v9, %v97_v9  ;;  %v751_v13 = vld [vmem:[#allocation7 + $0x10] sm:$0xff]   ;;  %v752_v14 = vld [vmem:[#allocation7 + $0x18] sm:$0xff]   ;;  %v753_v15 = vld [vmem:[#allocation7 + $0x20] sm:$0xff]   ;;  %p888_p12 = scmp.ne.s32.totalorder %s565_s24, %s887_s25  ;;  %p893_p0 = scmp.lt.s32.totalorder %s887_s25, %s887_s25 }
  0x5e   :  { %v754_v16 = vld [vmem:[#allocation7 + $0x28] sm:$0xff]   ;;  %v755_v17 = vld [vmem:[#allocation7 + $0x30] sm:$0xff]   ;;  %v756_v18 = vld [vmem:[#allocation7 + $0x38] sm:$0xff]  }
  0x5f   :  { %v757_v19 = vld [vmem:[#allocation8] sm:$0xff]   ;;  %v575_v20 = vld [vmem:[%s1111_s2] ss:$0 sm:$0xff]  ;;  %v758_v36 = vld [vmem:[#allocation8 + $0x8] sm:$0xff]   ;;  %p894_p1 = por %p893_p0, %p892_p13 }
  0x60   :  { %649 = vmatpush3.bf16.msra.mxu1 %v742_v2  ;;  %687 = vmatpush3.bf16.msra.mxu0 %v757_v19  ;;  %v759_v37 = vld [vmem:[#allocation8 + $0x10] sm:$0xff]   ;;  %v760_v38 = vld [vmem:[#allocation8 + $0x18] sm:$0xff]   ;;  %v761_v39 = vld [vmem:[#allocation8 + $0x20] sm:$0xff]  }
  0x61   :  { %650 = vmatprep.subr.bf16.mxu1 %v924_v0  ;;  %688 = vmatprep.subr.bf16.mxu0 %v924_v0  ;;  %v762_v40 = vld [vmem:[#allocation8 + $0x28] sm:$0xff]   ;;  %v763_v41 = vld [vmem:[#allocation8 + $0x30] sm:$0xff]   ;;  %v764_v42 = vld [vmem:[#allocation8 + $0x38] sm:$0xff]   ;;  %p895_p2 = pnand %p894_p1, %p888_p12 }
  0x62   :  { %v584_v43 = vld [vmem:[%s1113_s4] ss:$0 sm:$0xff]  ;;  %v765_v58 = vld [vmem:[#allocation10] sm:$0xff]   ;;  %v766_v60 = vld [vmem:[#allocation10 + $0x8] sm:$0xff]  }
  0x63   :  { %v767_v61 = vld [vmem:[#allocation10 + $0x10] sm:$0xff]   ;;  %v768_v62 = vld [vmem:[#allocation10 + $0x18] sm:$0xff]   ;;  %v769_v63 = vld [vmem:[#allocation10 + $0x20] sm:$0xff]  }
  0x64   :  { %651 = vmatpush3.bf16.msra.mxu1 %v743_v3  ;;  %689 = vmatpush3.bf16.msra.mxu0 %v758_v36  ;;  %v770_v1 = vld [vmem:[#allocation10 + $0x28] sm:$0xff]   ;;  %v771_v2 = vld [vmem:[#allocation10 + $0x30] sm:$0xff]   ;;  %v772_v3 = vld [vmem:[#allocation10 + $0x38] sm:$0xff]  }
  0x65   :  { %652 = vmatprep.subr.bf16.mxu1 %v924_v0  ;;  %690 = vmatprep.subr.bf16.mxu0 %v924_v0 }
  0x68   :  { %653 = vmatpush3.bf16.msra.mxu1 %v744_v4  ;;  %691 = vmatpush3.bf16.msra.mxu0 %v759_v37  ;;  %v593_v4 = vld [vmem:[%s1115_s6] ss:$0 sm:$0xff] }
  0x69   :  { %654 = vmatprep.subr.bf16.mxu1 %v924_v0  ;;  %692 = vmatprep.subr.bf16.mxu0 %v924_v0 }
  0x6c   :  { %655 = vmatpush3.bf16.msra.mxu1 %v745_v5  ;;  %693 = vmatpush3.bf16.msra.mxu0 %v760_v38 }
  0x6d   :  { %656 = vmatprep.subr.bf16.mxu1 %v924_v0  ;;  %694 = vmatprep.subr.bf16.mxu0 %v924_v0 }
  0x70   :  { %657 = vmatpush3.bf16.msra.mxu1 %v746_v6  ;;  %695 = vmatpush3.bf16.msra.mxu0 %v761_v39 }
  0x71   :  { %658 = vmatprep.subr.bf16.mxu1 %v924_v0  ;;  %696 = vmatprep.subr.bf16.mxu0 %v924_v0 }
  0x74   :  { %659 = vmatpush3.bf16.msra.mxu1 %v747_v7  ;;  %697 = vmatpush3.bf16.msra.mxu0 %v762_v40 }
  0x75   :  { %660 = vmatprep.subr.bf16.mxu1 %v924_v0  ;;  %698 = vmatprep.subr.bf16.mxu0 %v924_v0 }
  0x78   :  { %661 = vmatpush3.bf16.msra.mxu1 %v748_v8  ;;  %699 = vmatpush3.bf16.msra.mxu0 %v763_v41 }
  0x79   :  { %666 = vmatprep.subr.bf16.mxu1 %v924_v0  ;;  %700 = vmatprep.subr.bf16.mxu0 %v924_v0 }
  0x7b   :  { %663 = vmatmul.mubr.bf16.vlgmr.msra.gmra.mrb[0].mxu1 %v1057_v10 }
  0x7c   :  { %667 = vmatpush3.bf16.msra.mxu1 %v749_v11  ;;  %682 = vmatprep.mubr.msk.bf16.mxu1 %vm925_vm0, %v924_v0 }
  0x7d   :  { %668 = vmatprep.subr.bf16.mxu1 %v924_v0  ;;  %701 = vmatpush3.bf16.msra.mxu0 %v764_v42 }
  0x7e   :  { %706 = vmatprep.subr.bf16.mxu0 %v924_v0 }
  0x80   :  { %669 = vmatpush3.bf16.msra.mxu1 %v750_v12 }
  0x81   :  { %670 = vmatprep.subr.bf16.mxu1 %v924_v0 }
  0x84   :  { %671 = vmatpush3.bf16.msra.mxu1 %v751_v13 }
  0x85   :  { %672 = vmatprep.subr.bf16.mxu1 %v924_v0 }
  0x88   :  { %673 = vmatpush3.bf16.msra.mxu1 %v752_v14 }
  0x89   :  { %674 = vmatprep.subr.bf16.mxu1 %v924_v0 }
  0x8c   :  { %675 = vmatpush3.bf16.msra.mxu1 %v753_v15 }
  0x8d   :  { %676 = vmatprep.subr.bf16.mxu1 %v924_v0 }
  0x90   :  { %677 = vmatpush3.bf16.msra.mxu1 %v754_v16 }
  0x91   :  { %678 = vmatprep.subr.bf16.mxu1 %v924_v0 }
  0x94   :  { %679 = vmatpush3.bf16.msra.mxu1 %v755_v17 }
  0x95   :  { %680 = vmatprep.subr.bf16.mxu1 %v924_v0 }
  0x98   :  { %681 = vmatpush3.bf16.msra.mxu1 %v756_v18 }
 0x14e   :  { %v204_v21 = vpop.f32.mrb[0].mxu1 }
 0x14f   :  { %v205_v22 = vadd.f32 %v575_v20, %v204_v21  ;;  %v664_v23 = vpop.f32.mrb[1].mxu1 }
 0x150   :  { %v207_v24 = vpop.f32.mrb[2].mxu1 }
 0x151   :  { %v211_v25 = vmul.f32 0.044715, %v205_v22  ;;  %v665_v26 = vpop.f32.mrb[3].mxu1  ;;  %v210_v32 = vmul.f32 0.5, %v205_v22 }
 0x153   :  { %v212_v27 = vmul.f32 %v211_v25, %v205_v22 }
 0x155   :  { %v213_v28 = vmul.f32 %v212_v27, %v205_v22 }
 0x157   :  { %v214_v29 = vadd.f32 %v213_v28, %v205_v22 }
 0x159   :  { %v215_v30 = vmul.f32 0.7978846, %v214_v29 }
 0x15b   :  { %773 = vtanh.f32 %v215_v30 }
 0x165   :  { %v774_v31 = vpop.eup %773 }
 0x166   :  { %v217_v33 = vadd.f32 1.0, %v774_v31 }
 0x168   :  { %v218_v34 = vmul.f32 %v217_v33, %v210_v32 }
 0x16a   :  { %v219_v35 = vpack.c.bf16 %v218_v34, %v218_v34 }
 0x16c   :  { %683 = vmatmul.mubr.bf16.vlgmr.msra.gmra.mrb[4].mxu1 %v219_v35 }
 0x23f   :  { %v325_v44 = vpop.f32.mrb[4].mxu1 }
 0x240   :  { %v326_v45 = vadd.f32 %v584_v43, %v325_v44  ;;  %v684_v46 = vpop.f32.mrb[5].mxu1 }
 0x241   :  { %v328_v47 = vpop.f32.mrb[6].mxu1 }
 0x242   :  { %v332_v48 = vmul.f32 0.044715, %v326_v45  ;;  %v685_v49 = vpop.f32.mrb[7].mxu1  ;;  %v331_v55 = vmul.f32 0.5, %v326_v45 }
 0x244   :  { %v333_v50 = vmul.f32 %v332_v48, %v326_v45 }
 0x246   :  { %v334_v51 = vmul.f32 %v333_v50, %v326_v45 }
 0x248   :  { %v335_v52 = vadd.f32 %v334_v51, %v326_v45 }
 0x24a   :  { %v336_v53 = vmul.f32 0.7978846, %v335_v52 }
 0x24c   :  { %775 = vtanh.f32 %v336_v53 }
 0x256   :  { %v776_v54 = vpop.eup %775 }
 0x257   :  { %v338_v56 = vadd.f32 1.0, %v776_v54 }
 0x259   :  { %v339_v57 = vmul.f32 %v338_v56, %v331_v55 }
 0x25b   :  { %v340_v59 = vpack.c.bf16 %v339_v57, %v339_v57 }
 0x25d   :  { %703 = vmatmul.mubr.bf16.vlgmr.msra.gmra.mrb[0].mxu0 %v340_v59 }
 0x25e   :  { %707 = vmatpush3.bf16.msra.mxu0 %v765_v58  ;;  %722 = vmatprep.mubr.msk.bf16.mxu0 %vm925_vm0, %v924_v0 }
 0x25f   :  { %708 = vmatprep.subr.bf16.mxu0 %v924_v0 }
 0x262   :  { %709 = vmatpush3.bf16.msra.mxu0 %v766_v60 }
 0x263   :  { %710 = vmatprep.subr.bf16.mxu0 %v924_v0 }
 0x266   :  { %711 = vmatpush3.bf16.msra.mxu0 %v767_v61 }
 0x267   :  { %712 = vmatprep.subr.bf16.mxu0 %v924_v0 }
 0x26a   :  { %713 = vmatpush3.bf16.msra.mxu0 %v768_v62 }
 0x26b   :  { %714 = vmatprep.subr.bf16.mxu0 %v924_v0 }
 0x26e   :  { %715 = vmatpush3.bf16.msra.mxu0 %v769_v63 }
 0x26f   :  { %716 = vmatprep.subr.bf16.mxu0 %v924_v0 }
 0x272   :  { %717 = vmatpush3.bf16.msra.mxu0 %v770_v1 }
 0x273   :  { %718 = vmatprep.subr.bf16.mxu0 %v924_v0 }
 0x276   :  { %719 = vmatpush3.bf16.msra.mxu0 %v771_v2 }
 0x277   :  { %720 = vmatprep.subr.bf16.mxu0 %v924_v0 }
 0x27a   :  { %721 = vmatpush3.bf16.msra.mxu0 %v772_v3 }
 0x27d   :  { %723 = vmatmul.mubr.bf16.vlgmr.msra.gmra.mrb[0].mxu0 %v1057_v10 }
 0x350   :  { %v550_v5 = vpop.f32.mrb[0].mxu0 }
 0x351   :  { %v726_v6 = vadd.f32 %v593_v4, %v550_v5  ;;  %v724_v7 = vpop.f32.mrb[1].mxu0 }
 0x352   :  { %v553_v8 = vpop.f32.mrb[2].mxu0 }
 0x353   :  { %557 = vst [vmem:[#allocation11] sm:$0xff] %v726_v6  ;;  %v725_v9 = vpop.f32.mrb[3].mxu0 }
 0x354   :  { %898 = shalt.err (!%p895_p2)
}
 0x355   :  { %s899_s6 = scalar_lea.hbm %s1117_s8, 128 }
 0x356   :  { %p900_p3 = scmp.ne.s32.totalorder %s1117_s8, %s899_s6  ;;  %p903_p4 = scmp.lt.u32.totalorder %s899_s6, %s1117_s8 }
 0x358   :  { %p905_p5 = pnand %p903_p4, %p900_p3 }
 0x35a   :  { %908 = shalt.err (!%p905_p5)
}
 0x35b   :  { %567 = dma.vmem_to_hbm [thread:$0]  %s565_s24, 128, %s1117_s8, [#allocation4]  }
 0x35c   :  { %915 = dma.done.wait [#allocation4], 128  }
 0x35d   :  { %916 = vsyncadd [#allocation4], 4294967168 }
 0x35e   :  { %571 = vsyncpa [#allocation3], 1 }
 0x35f   :  { %572 = vsyncpa [#allocation6], 1 }
 0x360   :  { %573 = vsyncpa [#allocation9], 1 }
 0x361   :  { %574 = vsyncpa [#allocation4], 1 }

</bundles_post_ra>
